<compile_context>
chip_gen: v7x
topology: tpu7x:2x2x1
jax: 0.10.0
libtpu: 0.0.40
codegen_flags: <defaults>
</compile_context>

<pallas_src>
import functools

import jax
import jax.numpy as jnp
from jax.experimental import pallas as pl
from jax.experimental.pallas import tpu as pltpu


def _chamfer_kernel(inv_na, inv_no, ori_ref, adv_ref, out_ref,
                    colmin_ref, rowmin_ref):
    """One (batch-block, ori-tile, adv-tile) grid step.

    ori_ref    : (Bb, No_t, D)  ori points (point index -> sublanes of P).
    adv_ref    : (Bb, D, Na_t)  adv points, transposed (point index -> lanes).
    out_ref    : (Bb, 2)        [:, 0] = loss1 (adv2ori), [:, 1] = loss2
                                (ori2adv); accumulator-resident across the
                                two tile axes.
    colmin_ref : (n_ja, Bb, Na_t) running min over ori tiles, per adv tile.
    rowmin_ref : (Bb, No_t)       running min over adv tiles, current ori tile.
    """
    io = pl.program_id(1)          # ori-tile index (outer reduction axis)
    ja = pl.program_id(2)          # adv-tile index (inner reduction axis)
    n_io = pl.num_programs(1)
    n_ja = pl.num_programs(2)

    ori = ori_ref[...].astype(jnp.float32)     # (Bb, No_t, D)
    adv = adv_ref[...].astype(jnp.float32)     # (Bb, D, Na_t)
    d_dim = ori.shape[-1]

    # P[b, i, j] = sum_d (ori[b, i, d] - adv[b, d, j])^2   -- pure VPU work.
    p = None
    for d in range(d_dim):                                 # unrolled, D == 3
        diff = ori[:, :, d:d + 1] - adv[:, d:d + 1, :]     # (Bb, No_t, Na_t)
        sq = diff * diff
        p = sq if p is None else p + sq

    tile_col_min = jnp.min(p, axis=1)   # (Bb, Na_t): min over ori points
    tile_row_min = jnp.min(p, axis=2)   # (Bb, No_t): min over adv points

    # Zero the fused loss accumulator at the first reduction step of a batch.
    @pl.when(jnp.logical_and(io == 0, ja == 0))
    def _init_out():
        out_ref[...] = jnp.zeros_like(out_ref)

    # Running column minima (over ori tiles) for the current adv tile `ja`.
    @pl.when(io == 0)
    def _col_init():
        colmin_ref[ja] = tile_col_min

    @pl.when(io > 0)
    def _col_update():
        colmin_ref[ja] = jnp.minimum(colmin_ref[ja], tile_col_min)

    # Running row minima (over adv tiles) for the current ori tile `io`.
    @pl.when(ja == 0)
    def _row_init():
        rowmin_ref[...] = tile_row_min

    @pl.when(ja > 0)
    def _row_update():
        rowmin_ref[...] = jnp.minimum(rowmin_ref[...], tile_row_min)

    # After the last ori tile, colmin[ja] is final: fold into loss1 (mean over
    # adv points of min distance to the ori set).
    @pl.when(io == n_io - 1)
    def _loss1_accum():
        p1 = jnp.sum(colmin_ref[ja], axis=1, keepdims=True)   # (Bb, 1)
        out_ref[:, 0:1] = out_ref[:, 0:1] + p1 * inv_na

    # After the last adv tile, rowmin is final for ori tile io: fold into
    # loss2 (mean over ori points of min distance to the adv set).
    @pl.when(ja == n_ja - 1)
    def _loss2_accum():
        p2 = jnp.sum(rowmin_ref[...], axis=1, keepdims=True)  # (Bb, 1)
        out_ref[:, 1:2] = out_ref[:, 1:2] + p2 * inv_no


def _largest_divisor_leq(n, cap):
    for d in range(min(cap, n), 0, -1):
        if n % d == 0:
            return d
    return 1


def _pick_tile(n, candidates):
    for c in candidates:
        if c <= n and n % c == 0:
            return c
    return n  # fall back to a full-extent block (always legal)


def _chamfer_losses(adv_pc, ori_pc, *, no_tile=None, na_tile=None,
                    batch_block=None):
    B, Na, D = adv_pc.shape
    _, No, _ = ori_pc.shape

    # Lane-dense adv layout: adv point index on the 128-lane axis.
    adv_t = jnp.transpose(adv_pc, (0, 2, 1))                   # (B, D, Na)

    Bb = batch_block if batch_block is not None else _largest_divisor_leq(B, 8)
    No_t = no_tile if no_tile is not None else _pick_tile(
        No, (256, 128, 64, 32, 16, 8))
    Na_t = na_tile if na_tile is not None else _pick_tile(Na, (256, 128))

    assert B % Bb == 0 and No % No_t == 0 and Na % Na_t == 0, (
        "batch_block / no_tile / na_tile must evenly divide the array dims")

    nb, n_io, n_ja = B // Bb, No // No_t, Na // Na_t

    kernel = functools.partial(
        _chamfer_kernel, 1.0 / float(Na), 1.0 / float(No))

    out = pl.pallas_call(
        kernel,
        out_shape=jax.ShapeDtypeStruct((B, 2), jnp.float32),
        grid_spec=pltpu.PrefetchScalarGridSpec(
            num_scalar_prefetch=0,
            grid=(nb, n_io, n_ja),
            in_specs=[
                pl.BlockSpec((Bb, No_t, D), lambda b, io, ja: (b, io, 0)),
                pl.BlockSpec((Bb, D, Na_t), lambda b, io, ja: (b, 0, ja)),
            ],
            out_specs=pl.BlockSpec((Bb, 2), lambda b, io, ja: (b, 0)),
            scratch_shapes=[
                pltpu.VMEM((n_ja, Bb, Na_t), jnp.float32),  # col-min per adv tile
                pltpu.VMEM((Bb, No_t), jnp.float32),        # row-min, current ori tile
            ],
        ),
        compiler_params=pltpu.CompilerParams(
            dimension_semantics=("parallel", "arbitrary", "arbitrary"),
        ),
    )(ori_pc, adv_t)
    return out[:, 0], out[:, 1]


def chamfer_dist(adv_pc, ori_pc, weights=None, method="adv2ori",
                 batch_avg=True, *, no_tile=None, na_tile=None,
                 batch_block=None):
    """JAX/Pallas equivalent of ChamferDist.forward."""
    B = adv_pc.shape[0]
    loss1, loss2 = _chamfer_losses(adv_pc, ori_pc, no_tile=no_tile,
                                   na_tile=na_tile, batch_block=batch_block)
    if method == "adv2ori":
        loss = loss1
    elif method == "ori2adv":
        loss = loss2
    else:
        loss = (loss1 + loss2) / 2.0
    if weights is None:
        weights = jnp.ones((B,), dtype=jnp.float32)
    loss = loss * weights.astype(jnp.float32)
    if batch_avg:
        return jnp.mean(loss)
    return loss


def _reference(adv_pc, ori_pc, method="adv2ori", batch_avg=True):
    # Pure-JAX reference mirroring the PyTorch math, for a correctness check.
    ori = ori_pc.astype(jnp.float32)
    adv = adv_pc.astype(jnp.float32)
    zz = jnp.einsum("bid,bjd->bij", ori, adv)
    rx = jnp.sum(ori * ori, axis=-1)[:, :, None]
    ry = jnp.sum(adv * adv, axis=-1)[:, None, :]
    P = rx + ry - 2.0 * zz                        # (B, No, Na)
    loss1 = jnp.mean(jnp.min(P, axis=1), axis=1)  # adv2ori
    loss2 = jnp.mean(jnp.min(P, axis=2), axis=1)  # ori2adv
    loss = loss1 if method == "adv2ori" else (loss2 if method == "ori2adv"
                                              else (loss1 + loss2) / 2.0)
    return jnp.mean(loss) if batch_avg else loss


if __name__ == "__main__":
    key = jax.random.PRNGKey(0)
    k1, k2, k3, k4 = jax.random.split(key, 4)
    D = 3

    # Case 1: small clouds -> single-tile path, 2 batch elems per grid step.
    B, N_ADV, N_ORI = 2, 64, 64
    adv_pc = jax.random.normal(k1, (B, N_ADV, D), dtype=jnp.float32)
    ori_pc = jax.random.normal(k2, (B, N_ORI, D), dtype=jnp.float32)
    out1 = jax.block_until_ready(
        chamfer_dist(adv_pc, ori_pc, method="adv2ori", batch_avg=True))
    ref1 = jax.block_until_ready(
        _reference(adv_pc, ori_pc, method="adv2ori", batch_avg=True))
    assert jnp.allclose(out1, ref1, atol=1e-4, rtol=1e-4), (out1, ref1)

    # Case 2: multi-tile path (2 ori tiles x 2 adv tiles, 2 batch grid steps),
    # exercising the running-min accumulation and both loss directions.
    B2, NA2, NO2 = 2, 256, 128
    adv2 = jax.random.normal(k3, (B2, NA2, D), dtype=jnp.float32)
    ori2 = jax.random.normal(k4, (B2, NO2, D), dtype=jnp.float32)
    out2 = jax.block_until_ready(
        chamfer_dist(adv2, ori2, method="both", batch_avg=False,
                     no_tile=64, na_tile=128, batch_block=1))
    ref2 = jax.block_until_ready(
        _reference(adv2, ori2, method="both", batch_avg=False))
    assert jnp.allclose(out2, ref2, atol=1e-4, rtol=1e-4), (out2, ref2)

    out3 = jax.block_until_ready(
        chamfer_dist(adv2, ori2, method="ori2adv", batch_avg=True,
                     no_tile=64, na_tile=128, batch_block=1))
    ref3 = jax.block_until_ready(
        _reference(adv2, ori2, method="ori2adv", batch_avg=True))
    assert jnp.allclose(out3, ref3, atol=1e-4, rtol=1e-4), (out3, ref3)

    print("KERNEL_OK")
</pallas_src>

<mosaic_0001>
module attributes {stable_mosaic.version = 11 : i64} {
  func.func @_chamfer_kernel(%arg0: i32, %arg1: i32, %arg2: i32, %arg3: memref<2x64x3xf32, #tpu.memory_space<vmem>>, %arg4: memref<2x3x64xf32, #tpu.memory_space<vmem>>, %arg5: memref<2x2xf32, #tpu.memory_space<vmem>>, %arg6: memref<1x2x64xf32, #tpu.memory_space<vmem>>, %arg7: memref<2x64xf32, #tpu.memory_space<vmem>>) attributes {dimension_semantics = [#tpu.dimension_semantics<parallel>, #tpu.dimension_semantics<arbitrary>, #tpu.dimension_semantics<arbitrary>], iteration_bounds = array<i64: 1, 1, 1>, scalar_prefetch = 0 : i64, scratch_operands = 2 : i64, tpu.core_type = #tpu.core_type<tc>, window_params = [{transform_indices = @transform_0, window_bounds = array<i64: 2, 64, 3>}, {transform_indices = @transform_1, window_bounds = array<i64: 2, 3, 64>}, {transform_indices = @transform_2, window_bounds = array<i64: 2, 2>}]} {
    %c0 = arith.constant 0 : index
    %c0_0 = arith.constant 0 : index
    %c0_1 = arith.constant 0 : index
    %0 = vector.load %arg3[%c0, %c0_0, %c0_1] : memref<2x64x3xf32, #tpu.memory_space<vmem>>, vector<2x64x3xf32>
    %c0_2 = arith.constant 0 : index
    %c0_3 = arith.constant 0 : index
    %c0_4 = arith.constant 0 : index
    %1 = vector.load %arg4[%c0_2, %c0_3, %c0_4] : memref<2x3x64xf32, #tpu.memory_space<vmem>>, vector<2x3x64xf32>
    %2 = vector.extract_strided_slice %0 {offsets = [0, 0, 0], sizes = [2, 64, 1], strides = [1, 1, 1]} : vector<2x64x3xf32> to vector<2x64x1xf32>
    %3 = vector.extract_strided_slice %1 {offsets = [0, 0, 0], sizes = [2, 1, 64], strides = [1, 1, 1]} : vector<2x3x64xf32> to vector<2x1x64xf32>
    %4 = vector.broadcast %2 : vector<2x64x1xf32> to vector<2x64x64xf32>
    %5 = vector.broadcast %3 : vector<2x1x64xf32> to vector<2x64x64xf32>
    %6 = arith.subf %4, %5 : vector<2x64x64xf32>
    %7 = arith.mulf %6, %6 : vector<2x64x64xf32>
    %8 = vector.extract_strided_slice %0 {offsets = [0, 0, 1], sizes = [2, 64, 1], strides = [1, 1, 1]} : vector<2x64x3xf32> to vector<2x64x1xf32>
    %9 = vector.extract_strided_slice %1 {offsets = [0, 1, 0], sizes = [2, 1, 64], strides = [1, 1, 1]} : vector<2x3x64xf32> to vector<2x1x64xf32>
    %10 = vector.broadcast %8 : vector<2x64x1xf32> to vector<2x64x64xf32>
    %11 = vector.broadcast %9 : vector<2x1x64xf32> to vector<2x64x64xf32>
    %12 = arith.subf %10, %11 : vector<2x64x64xf32>
    %13 = arith.mulf %12, %12 : vector<2x64x64xf32>
    %14 = arith.addf %7, %13 : vector<2x64x64xf32>
    %15 = vector.extract_strided_slice %0 {offsets = [0, 0, 2], sizes = [2, 64, 1], strides = [1, 1, 1]} : vector<2x64x3xf32> to vector<2x64x1xf32>
    %16 = vector.extract_strided_slice %1 {offsets = [0, 2, 0], sizes = [2, 1, 64], strides = [1, 1, 1]} : vector<2x3x64xf32> to vector<2x1x64xf32>
    %17 = vector.broadcast %15 : vector<2x64x1xf32> to vector<2x64x64xf32>
    %18 = vector.broadcast %16 : vector<2x1x64xf32> to vector<2x64x64xf32>
    %19 = arith.subf %17, %18 : vector<2x64x64xf32>
    %20 = arith.mulf %19, %19 : vector<2x64x64xf32>
    %21 = arith.addf %14, %20 : vector<2x64x64xf32>
    %cst = arith.constant dense<0x7F800000> : vector<2x64xf32>
    %22 = vector.multi_reduction <minimumf>, %21, %cst [1] : vector<2x64x64xf32> to vector<2x64xf32>
    %cst_5 = arith.constant dense<0x7F800000> : vector<2x64xf32>
    %23 = vector.multi_reduction <minimumf>, %21, %cst_5 [2] : vector<2x64x64xf32> to vector<2x64xf32>
    %c0_i32 = arith.constant 0 : i32
    %24 = arith.cmpi eq, %arg1, %c0_i32 : i32
    %c0_i32_6 = arith.constant 0 : i32
    %25 = arith.cmpi eq, %arg2, %c0_i32_6 : i32
    %26 = arith.andi %24, %25 : i1
    %27 = arith.extui %26 : i1 to i32
    %c0_i32_7 = arith.constant 0 : i32
    %28 = arith.cmpi ne, %27, %c0_i32_7 : i32
    scf.if %28 {
      %cst_20 = arith.constant 0.000000e+00 : f32
      %47 = vector.broadcast %cst_20 : f32 to vector<2x2xf32>
      %c0_21 = arith.constant 0 : index
      %c0_22 = arith.constant 0 : index
      %48 = vector.load %arg5[%c0_21, %c0_22] : memref<2x2xf32, #tpu.memory_space<vmem>>, vector<2x2xf32>
      tpu.vector_store %arg5[%c0_21, %c0_22], %47 {strides = array<i32>} : memref<2x2xf32, #tpu.memory_space<vmem>>, vector<2x2xf32>,
    } else {
    }
    %c0_i32_8 = arith.constant 0 : i32
    %29 = arith.cmpi eq, %arg1, %c0_i32_8 : i32
    %30 = arith.extui %29 : i1 to i32
    %c0_i32_9 = arith.constant 0 : i32
    %31 = arith.cmpi ne, %30, %c0_i32_9 : i32
    scf.if %31 {
      %47 = arith.index_cast %arg2 : i32 to index
      %c0_20 = arith.constant 0 : index
      %c0_21 = arith.constant 0 : index
      %48 = vector.load %arg6[%47, %c0_20, %c0_21] : memref<1x2x64xf32, #tpu.memory_space<vmem>>, vector<1x2x64xf32>
      %49 = vector.shape_cast %48 : vector<1x2x64xf32> to vector<2x64xf32>
      %50 = vector.shape_cast %22 : vector<2x64xf32> to vector<1x2x64xf32>
      tpu.vector_store %arg6[%47, %c0_20, %c0_21], %50 {strides = array<i32>} : memref<1x2x64xf32, #tpu.memory_space<vmem>>, vector<1x2x64xf32>,
    } else {
    }
    %c0_i32_10 = arith.constant 0 : i32
    %32 = arith.cmpi sgt, %arg1, %c0_i32_10 : i32
    %33 = arith.extui %32 : i1 to i32
    %c0_i32_11 = arith.constant 0 : i32
    %34 = arith.cmpi ne, %33, %c0_i32_11 : i32
    scf.if %34 {
      %47 = arith.index_cast %arg2 : i32 to index
      %c0_20 = arith.constant 0 : index
      %c0_21 = arith.constant 0 : index
      %48 = vector.load %arg6[%47, %c0_20, %c0_21] : memref<1x2x64xf32, #tpu.memory_space<vmem>>, vector<1x2x64xf32>
      %49 = vector.shape_cast %48 : vector<1x2x64xf32> to vector<2x64xf32>
      %50 = arith.minimumf %49, %22 : vector<2x64xf32>
      %51 = arith.index_cast %arg2 : i32 to index
      %c0_22 = arith.constant 0 : index
      %c0_23 = arith.constant 0 : index
      %52 = vector.load %arg6[%51, %c0_22, %c0_23] : memref<1x2x64xf32, #tpu.memory_space<vmem>>, vector<1x2x64xf32>
      %53 = vector.shape_cast %52 : vector<1x2x64xf32> to vector<2x64xf32>
      %54 = vector.shape_cast %50 : vector<2x64xf32> to vector<1x2x64xf32>
      tpu.vector_store %arg6[%51, %c0_22, %c0_23], %54 {strides = array<i32>} : memref<1x2x64xf32, #tpu.memory_space<vmem>>, vector<1x2x64xf32>,
    } else {
    }
    %c0_i32_12 = arith.constant 0 : i32
    %35 = arith.cmpi eq, %arg2, %c0_i32_12 : i32
    %36 = arith.extui %35 : i1 to i32
    %c0_i32_13 = arith.constant 0 : i32
    %37 = arith.cmpi ne, %36, %c0_i32_13 : i32
    scf.if %37 {
      %c0_20 = arith.constant 0 : index
      %c0_21 = arith.constant 0 : index
      %47 = vector.load %arg7[%c0_20, %c0_21] : memref<2x64xf32, #tpu.memory_space<vmem>>, vector<2x64xf32>
      tpu.vector_store %arg7[%c0_20, %c0_21], %23 {strides = array<i32>} : memref<2x64xf32, #tpu.memory_space<vmem>>, vector<2x64xf32>,
    } else {
    }
    %c0_i32_14 = arith.constant 0 : i32
    %38 = arith.cmpi sgt, %arg2, %c0_i32_14 : i32
    %39 = arith.extui %38 : i1 to i32
    %c0_i32_15 = arith.constant 0 : i32
    %40 = arith.cmpi ne, %39, %c0_i32_15 : i32
    scf.if %40 {
      %c0_20 = arith.constant 0 : index
      %c0_21 = arith.constant 0 : index
      %47 = vector.load %arg7[%c0_20, %c0_21] : memref<2x64xf32, #tpu.memory_space<vmem>>, vector<2x64xf32>
      %48 = arith.minimumf %47, %23 : vector<2x64xf32>
      %c0_22 = arith.constant 0 : index
      %c0_23 = arith.constant 0 : index
      %49 = vector.load %arg7[%c0_22, %c0_23] : memref<2x64xf32, #tpu.memory_space<vmem>>, vector<2x64xf32>
      tpu.vector_store %arg7[%c0_22, %c0_23], %48 {strides = array<i32>} : memref<2x64xf32, #tpu.memory_space<vmem>>, vector<2x64xf32>,
    } else {
    }
    %c0_i32_16 = arith.constant 0 : i32
    %41 = arith.cmpi eq, %arg1, %c0_i32_16 : i32
    %42 = arith.extui %41 : i1 to i32
    %c0_i32_17 = arith.constant 0 : i32
    %43 = arith.cmpi ne, %42, %c0_i32_17 : i32
    scf.if %43 {
      %47 = arith.index_cast %arg2 : i32 to index
      %c0_20 = arith.constant 0 : index
      %c0_21 = arith.constant 0 : index
      %48 = vector.load %arg6[%47, %c0_20, %c0_21] : memref<1x2x64xf32, #tpu.memory_space<vmem>>, vector<1x2x64xf32>
      %49 = vector.shape_cast %48 : vector<1x2x64xf32> to vector<2x64xf32>
      %cst_22 = arith.constant dense<0.000000e+00> : vector<2xf32>
      %50 = vector.multi_reduction <add>, %49, %cst_22 [1] : vector<2x64xf32> to vector<2xf32>
      %51 = vector.shape_cast %50 : vector<2xf32> to vector<2x1xf32>
      %c0_23 = arith.constant 0 : index
      %c0_24 = arith.constant 0 : index
      %52 = vector.load %arg5[%c0_23, %c0_24] : memref<2x2xf32, #tpu.memory_space<vmem>>, vector<2x1xf32>
      %cst_25 = arith.constant 1.562500e-02 : f32
      %53 = vector.broadcast %cst_25 : f32 to vector<2x1xf32>
      %54 = arith.mulf %51, %53 : vector<2x1xf32>
      %55 = arith.addf %52, %54 : vector<2x1xf32>
      %c0_26 = arith.constant 0 : index
      %c0_27 = arith.constant 0 : index
      %56 = vector.load %arg5[%c0_26, %c0_27] : memref<2x2xf32, #tpu.memory_space<vmem>>, vector<2x1xf32>
      tpu.vector_store %arg5[%c0_26, %c0_27], %55 {strides = array<i32>} : memref<2x2xf32, #tpu.memory_space<vmem>>, vector<2x1xf32>,
    } else {
    }
    %c0_i32_18 = arith.constant 0 : i32
    %44 = arith.cmpi eq, %arg2, %c0_i32_18 : i32
    %45 = arith.extui %44 : i1 to i32
    %c0_i32_19 = arith.constant 0 : i32
    %46 = arith.cmpi ne, %45, %c0_i32_19 : i32
    scf.if %46 {
      %c0_20 = arith.constant 0 : index
      %c0_21 = arith.constant 0 : index
      %47 = vector.load %arg7[%c0_20, %c0_21] : memref<2x64xf32, #tpu.memory_space<vmem>>, vector<2x64xf32>
      %cst_22 = arith.constant dense<0.000000e+00> : vector<2xf32>
      %48 = vector.multi_reduction <add>, %47, %cst_22 [1] : vector<2x64xf32> to vector<2xf32>
      %49 = vector.shape_cast %48 : vector<2xf32> to vector<2x1xf32>
      %c0_23 = arith.constant 0 : index
      %c1 = arith.constant 1 : index
      %50 = vector.load %arg5[%c0_23, %c1] : memref<2x2xf32, #tpu.memory_space<vmem>>, vector<2x1xf32>
      %cst_24 = arith.constant 1.562500e-02 : f32
      %51 = vector.broadcast %cst_24 : f32 to vector<2x1xf32>
      %52 = arith.mulf %49, %51 : vector<2x1xf32>
      %53 = arith.addf %50, %52 : vector<2x1xf32>
      %c0_25 = arith.constant 0 : index
      %c1_26 = arith.constant 1 : index
      %54 = vector.load %arg5[%c0_25, %c1_26] : memref<2x2xf32, #tpu.memory_space<vmem>>, vector<2x1xf32>
      tpu.vector_store %arg5[%c0_25, %c1_26], %53 {strides = array<i32>} : memref<2x2xf32, #tpu.memory_space<vmem>>, vector<2x1xf32>,
    } else {
    }
    return
  }
  func.func @transform_0(%arg0: i32, %arg1: i32, %arg2: i32) -> (i32, i32, i32) {
    %c0_i32 = arith.constant 0 : i32
    %c0_i32_0 = arith.constant 0 : i32
    return %arg0, %arg1, %c0_i32 : i32, i32, i32
  }
  func.func @transform_1(%arg0: i32, %arg1: i32, %arg2: i32) -> (i32, i32, i32) {
    %c0_i32 = arith.constant 0 : i32
    %c0_i32_0 = arith.constant 0 : i32
    return %arg0, %c0_i32, %arg2 : i32, i32, i32
  }
  func.func @transform_2(%arg0: i32, %arg1: i32, %arg2: i32) -> (i32, i32) {
    %c0_i32 = arith.constant 0 : i32
    %c0_i32_0 = arith.constant 0 : i32
    return %arg0, %c0_i32 : i32, i32
  }
}

</mosaic_0001>

<bundles_post_ra>
// kernel: tpu_custom_call.1
= control target key start
LH: loop header
LB: loop body
LE: loop exit
PB: predicated region body
PF: predicated region fallthrough
CT: control target
= control target key end

     0   :  { %v832_v2 = vmov 0   ;;  %s1142_s0 = inlined_call_operand.vmem [shape: f32[2,64,3], index: 0, kind: input, shape index: {}]   ;;  %s1143_s1 = inlined_call_operand.vmem [shape: f32[2,3,64], index: 1, kind: input, shape index: {}]   ;;  %s1144_s2 = inlined_call_operand.hbm [shape: f32[2,2], index: 2, kind: output, shape index: {}]  }
   0x1   :  { %v20_v0 = vld [vmem:[%s1142_s0 + $0x40] sm:$0xff]  ;;  %787 = vset.pattern.permute.xlu1 %v832_v2  ;;  %786 = vset.pattern.permute.xlu0 %v832_v2  ;;  %v21_v3 = vld [vmem:[%s1142_s0 + $0x48] sm:$0xff] }
   0x2   :  { %v12_v1 = vld [vmem:[%s1142_s0] sm:$0xff]  ;;  %72 = vperm.xlu1 %787, %v20_v0   ;;  %v13_v4 = vld [vmem:[%s1142_s0 + $0x8] sm:$0xff] }
   0x3   :  { %32 = vperm.xlu0 %786, %v12_v1  }
   0x6   :  { %77 = vperm.xlu1 %787, %v21_v3  }
   0x7   :  { %37 = vperm.xlu0 %786, %v13_v4  }
   0x8   :  { %7 = vsyncpa [#allocation5], 0  ;;  %v22_v5 = vld [vmem:[%s1142_s0 + $0x50] sm:$0xff]  ;;  %v833_v6 = vmov 1   ;;  %v15_v7 = vld [vmem:[%s1142_s0 + $0x18] sm:$0xff]  ;;  %v834_v14 = vmov 2   ;;  %v110_v24 = vlaneseq }
   0x9   :  { %v16_v8 = vld [vmem:[%s1142_s0 + $0x20] sm:$0xff]  ;;  %v14_v9 = vld [vmem:[%s1142_s0 + $0x10] sm:$0xff]  ;;  %v17_v10 = vld [vmem:[%s1142_s0 + $0x28] sm:$0xff]  ;;  %vm390_vm0 = vcmask 523264   ;;  %vm478_vm1 = vcmask 1041409   ;;  %vm483_vm2 = vcmask 517120  }
   0xa   :  { %788 = vset.pattern.permute.xlu1 %v833_v6  ;;  %v18_v11 = vld [vmem:[%s1142_s0 + $0x30] sm:$0xff]  ;;  %v19_v12 = vld [vmem:[%s1142_s0 + $0x38] sm:$0xff]  ;;  %v24_v15 = vld [vmem:[%s1142_s0 + $0x60] sm:$0xff]  ;;  %v923_v27 = vshrl.u32 %v110_v24, 7  ;;  %vm471_vm3 = vcmask 9216   ;;  %vm530_vm4 = vcmask 130112  }
   0xb   :  { %82 = vperm.xlu0 %786, %v22_v5   ;;  %155 = vperm.xlu1 %788, %v13_v4   ;;  %v23_v13 = vld [vmem:[%s1142_s0 + $0x58] sm:$0xff]  ;;  %v25_v16 = vld [vmem:[%s1142_s0 + $0x68] sm:$0xff]  ;;  %v26_v17 = vld [vmem:[%s1142_s0 + $0x70] sm:$0xff]  ;;  %vm537_vm5 = vcmask 195712   ;;  %vm544_vm6 = vcmask 261312   ;;  %vm551_vm7 = vcmask 326912  }
   0xc   :  { %v27_v18 = vld [vmem:[%s1142_s0 + $0x78] sm:$0xff]  ;;  %v28_v29 = vld [vmem:[%s1143_s1] sm:$0x7]  ;;  %v112_v31 = vsub.s32 0, %v923_v27  ;;  %v216_v41 = vsub.s32 1, %v923_v27  ;;  %v336_v48 = vsub.s32 2, %v923_v27 }
   0xd   :  { %v29_v55 = vld [vmem:[%s1143_s1 + $0x4] sm:$0x7]  ;;  %vm558_vm8 = vcmask 392512   ;;  %vm565_vm9 = vcmask 458112   ;;  %vm572_vm10 = vcmask 523712   ;;  %vm752_vm11 = vcmask 1024  }
   0xe   :  { %v933_v33 = vrot.slane %v28_v29, %v112_v31  ;;  %v947_v44 = vrot.slane %v28_v29, %v216_v41  ;;  %v954_v53 = vrot.slane %v28_v29, %v336_v48  ;;  %v961_v57 = vrot.slane %v29_v55, %v216_v41  ;;  %s836_s1 = smov [#allocation4]  }
   0xf   :  { %47 = vperm.xlu0 %786, %v15_v7   ;;  %183 = vperm.xlu1 %788, %v20_v0   ;;  %v964_v60 = vrot.slane %v29_v55, %v112_v31  ;;  %s773_s16 = sshll.u32 %s836_s1, 4  ;;  %vm765_vm12 = vcmask 9224   ;;  %s774_s16 = int_to_ptr.vmem [resolvable:$true] %s773_s16 }
  0x10   :  { %s808_s17 = scalar_lea.vmem %s774_s16, 32  ;;  %p813_p1 = scmp.lt.s32.totalorder %s774_s16, %s774_s16 }
  0x11   :  { %p809_p0 = scmp.ne.s32.totalorder %s774_s16, %s808_s17  ;;  %p814_p2 = scmp.lt.s32.totalorder %s808_s17, %s808_s17 }
  0x13   :  { %52 = vperm.xlu0 %786, %v16_v8   ;;  %789 = vset.pattern.permute.xlu1 %v832_v2  ;;  %p815_p3 = por %p814_p2, %p813_p1 }
  0x14   :  { %42 = vperm.xlu1 %789, %v14_v9  }
  0x15   :  { %p816_p4 = pnand %p815_p3, %p809_p0 }
  0x17   :  { %57 = vperm.xlu0 %786, %v17_v10  }
  0x18   :  { %790 = vset.pattern.permute.xlu1 %v833_v6 }
  0x19   :  { %159 = vperm.xlu1 %790, %v14_v9  }
  0x1b   :  { %62 = vperm.xlu0 %786, %v18_v11  }
  0x1d   :  { %191 = vperm.xlu1 %790, %v22_v5  }
  0x1f   :  { %67 = vperm.xlu0 %786, %v19_v12  }
  0x21   :  { %791 = vset.pattern.permute.xlu1 %v832_v2 }
  0x22   :  { %87 = vperm.xlu1 %791, %v23_v13  }
  0x23   :  { %803 = vset.pattern.permute.xlu0 %v833_v6 }
  0x24   :  { %151 = vperm.xlu0 %803, %v12_v1  }
  0x26   :  { %792 = vset.pattern.permute.xlu1 %v833_v6 }
  0x27   :  { %195 = vperm.xlu1 %792, %v23_v13  }
  0x28   :  { %187 = vperm.xlu0 %803, %v21_v3  }
  0x2b   :  { %793 = vset.pattern.permute.xlu1 %v834_v14 }
  0x2c   :  { %163 = vperm.xlu0 %803, %v15_v7   ;;  %271 = vperm.xlu1 %793, %v12_v1  }
  0x30   :  { %199 = vperm.xlu0 %803, %v24_v15   ;;  %303 = vperm.xlu1 %793, %v20_v0  }
  0x34   :  { %203 = vperm.xlu0 %803, %v25_v16   ;;  %307 = vperm.xlu1 %793, %v21_v3  }
  0x38   :  { %207 = vperm.xlu0 %803, %v26_v17   ;;  %794 = vset.pattern.permute.xlu1 %v832_v2 }
  0x39   :  { %92 = vperm.xlu1 %794, %v24_v15  }
  0x3c   :  { %211 = vperm.xlu0 %803, %v27_v18  }
  0x3d   :  { %795 = vset.pattern.permute.xlu1 %v833_v6 }
  0x3e   :  { %167 = vperm.xlu1 %795, %v16_v8  }
  0x40   :  { %806 = vset.pattern.permute.xlu0 %v834_v14 }
  0x41   :  { %275 = vperm.xlu0 %806, %v13_v4   ;;  %v970_v4 = vrot.slane %v29_v55, %v336_v48 }
  0x42   :  { %796 = vset.pattern.permute.xlu1 %v834_v14 }
  0x43   :  { %279 = vperm.xlu1 %796, %v14_v9  }
  0x45   :  { %295 = vperm.xlu0 %806, %v18_v11  }
  0x47   :  { %311 = vperm.xlu1 %796, %v22_v5  }
  0x49   :  { %331 = vperm.xlu0 %806, %v27_v18  }
  0x4b   :  { %797 = vset.pattern.permute.xlu1 %v832_v2 }
  0x4c   :  { %97 = vperm.xlu1 %797, %v25_v16  }
  0x50   :  { %798 = vset.pattern.permute.xlu1 %v833_v6 }
  0x51   :  { %171 = vperm.xlu1 %798, %v17_v10  }
  0x55   :  { %799 = vset.pattern.permute.xlu1 %v834_v14 }
  0x56   :  { %283 = vperm.xlu1 %799, %v15_v7  }
  0x5a   :  { %315 = vperm.xlu1 %799, %v23_v13  }
  0x5e   :  { %800 = vset.pattern.permute.xlu1 %v832_v2 }
  0x5f   :  { %102 = vperm.xlu1 %800, %v26_v17  }
  0x63   :  { %801 = vset.pattern.permute.xlu1 %v833_v6 }
  0x64   :  { %175 = vperm.xlu1 %801, %v18_v11  }
  0x68   :  { %802 = vset.pattern.permute.xlu1 %v834_v14 }
  0x69   :  { %287 = vperm.xlu1 %802, %v16_v8  }
  0x6d   :  { %319 = vperm.xlu1 %802, %v24_v15  }
  0x71   :  { %804 = vset.pattern.permute.xlu1 %v832_v2 }
  0x72   :  { %107 = vperm.xlu1 %804, %v27_v18  }
  0x76   :  { %805 = vset.pattern.permute.xlu1 %v833_v6 }
  0x77   :  { %179 = vperm.xlu1 %805, %v19_v12  }
  0x7b   :  { %807 = vset.pattern.permute.xlu1 %v834_v14 }
  0x7c   :  { %291 = vperm.xlu1 %807, %v17_v10  }
  0x80   :  { %323 = vperm.xlu1 %807, %v25_v16  }
  0x81   :  { %v916_v19 = vpop.permute.xlu1 %72 }
  0x82   :  { %v33_v20 = vpop.permute.xlu0 %32 }
  0x83   :  { %v118_v46 = vsub.f32 %v33_v20, %v933_v33 }
  0x84   :  { %327 = vperm.xlu1 %807, %v26_v17  }
  0x85   :  { %v78_v21 = vpop.permute.xlu1 %77  ;;  %v134_v51 = vmul.f32 %v118_v46, %v118_v46 }
  0x86   :  { %v38_v22 = vpop.permute.xlu0 %37  ;;  %v127_v1 = vsub.f32 %v78_v21, %v964_v60 }
  0x87   :  { %v119_v17 = vsub.f32 %v38_v22, %v933_v33 }
  0x88   :  { %299 = vperm.xlu1 %807, %v19_v12   ;;  %v143_v9 = vmul.f32 %v127_v1, %v127_v1 }
  0x8a   :  { %v918_v23 = vpop.permute.xlu0 %82  ;;  %v156_v25 = vpop.permute.xlu1 %155 }
  0x8b   :  { %v223_v18 = vsub.f32 %v156_v25, %v947_v44 }
  0x8d   :  { %v239_v22 = vmul.f32 %v223_v18, %v223_v18 }
  0x8e   :  { %v920_v26 = vpop.permute.xlu0 %47  ;;  %v184_v28 = vpop.permute.xlu1 %183 }
  0x8f   :  { %v230_v31 = vsub.f32 %v184_v28, %v961_v57  ;;  %v121_v18 = vsub.f32 %v920_v26, %v933_v33 }
  0x92   :  { %v928_v30 = vpop.permute.xlu0 %52 }
  0x93   :  { %v931_v32 = vpop.permute.xlu1 %42 }
  0x96   :  { %v58_v34 = vpop.permute.xlu0 %57 }
  0x97   :  { %v936_v35 = vsub.f32 %v58_v34, %v933_v33  ;;  %v126_v34 = vsub.f32 %v916_v19, %v964_v60  ;;  %v120_v19 = vsub.f32 %v931_v32, %v933_v33 }
  0x98   :  { %v160_v36 = vpop.permute.xlu1 %159 }
  0x99   :  { %v224_v46 = vsub.f32 %v160_v36, %v947_v44  ;;  %v142_v48 = vmul.f32 %v126_v34, %v126_v34  ;;  %v136_v1 = vmul.f32 %v120_v19, %v120_v19  ;;  %v137_v34 = vmul.f32 %v121_v18, %v121_v18 }
  0x9a   :  { %v63_v37 = vpop.permute.xlu0 %62 }
  0x9b   :  { %v939_v38 = vsub.f32 %v63_v37, %v933_v33 }
  0x9c   :  { %v192_v39 = vpop.permute.xlu1 %191 }
  0x9d   :  { %v232_v28 = vsub.f32 %v192_v39, %v961_v57 }
  0x9e   :  { %v68_v40 = vpop.permute.xlu0 %67 }
  0x9f   :  { %v943_v42 = vsub.f32 %v68_v40, %v933_v33  ;;  %v135_v40 = vmul.f32 %v119_v17, %v119_v17 }
  0xa1   :  { %v945_v43 = vpop.permute.xlu1 %87 }
  0xa3   :  { %v152_v45 = vpop.permute.xlu0 %151 }
  0xa4   :  { %v222_v47 = vsub.f32 %v152_v45, %v947_v44  ;;  %v246_v45 = vmul.f32 %v230_v31, %v230_v31 }
  0xa6   :  { %v952_v49 = vpop.permute.xlu1 %195  ;;  %v238_v52 = vmul.f32 %v222_v47, %v222_v47 }
  0xa7   :  { %v188_v50 = vpop.permute.xlu0 %187 }
  0xa8   :  { %v254_v58 = vadd.f32 %v238_v52, %v134_v51  ;;  %v231_v61 = vsub.f32 %v188_v50, %v961_v57  ;;  %v128_v50 = vsub.f32 %v918_v23, %v964_v60  ;;  %v255_v51 = vadd.f32 %v239_v22, %v135_v40 }
  0xa9   :  { %v233_v40 = vsub.f32 %v952_v49, %v961_v57 }
  0xaa   :  { %v247_v3 = vmul.f32 %v231_v61, %v231_v61  ;;  %v240_v61 = vmul.f32 %v224_v46, %v224_v46 }
  0xab   :  { %v956_v54 = vpop.permute.xlu0 %163  ;;  %v272_v56 = vpop.permute.xlu1 %271  ;;  %v249_v46 = vmul.f32 %v233_v40, %v233_v40 }
  0xac   :  { %v342_v59 = vsub.f32 %v272_v56, %v954_v53  ;;  %v263_v11 = vadd.f32 %v247_v3, %v143_v9  ;;  %v256_v32 = vadd.f32 %v240_v61, %v136_v1 }
  0xae   :  { %v358_v62 = vmul.f32 %v342_v59, %v342_v59  ;;  %v262_v59 = vadd.f32 %v246_v45, %v142_v48 }
  0xaf   :  { %v967_v63 = vpop.permute.xlu0 %199  ;;  %v304_v0 = vpop.permute.xlu1 %303 }
  0xb0   :  { %v374_v2 = vadd.f32 %v358_v62, %v254_v58  ;;  %v350_v25 = vsub.f32 %v304_v0, %v970_v4  ;;  %v144_v62 = vmul.f32 %v128_v50, %v128_v50  ;;  %v248_v0 = vmul.f32 %v232_v28, %v232_v28 }
  0xb2   :  { %v973_v5 = vsel %vm390_vm0, %v374_v2, inf  ;;  %v366_v52 = vmul.f32 %v350_v25, %v350_v25 }
  0xb3   :  { %v204_v6 = vpop.permute.xlu0 %203  ;;  %v308_v7 = vpop.permute.xlu1 %307  ;;  %433 = vmin.xlane.f32.xlu1 %v973_v5 }
  0xb4   :  { %v977_v8 = vsub.f32 %v204_v6, %v961_v57  ;;  %v351_v10 = vsub.f32 %v308_v7, %v970_v4  ;;  %v382_v39 = vadd.f32 %v366_v52, %v262_v59  ;;  %v264_v7 = vadd.f32 %v248_v0, %v144_v62 }
  0xb5   :  { %v122_v62 = vsub.f32 %v928_v30, %v933_v33 }
  0xb6   :  { %v367_v12 = vmul.f32 %v351_v10, %v351_v10  ;;  %v1014_v10 = vsel %vm390_vm0, %v382_v39, inf }
  0xb7   :  { %v208_v13 = vpop.permute.xlu0 %207 }
  0xb8   :  { %v981_v14 = vsub.f32 %v208_v13, %v961_v57  ;;  %v983_v15 = vpop.permute.xlu1 %92  ;;  %v383_v16 = vadd.f32 %v367_v12, %v263_v11 }
  0xb9   :  { %v130_v39 = vsub.f32 %v983_v15, %v964_v60 }
  0xba   :  { %v988_v20 = vsel %vm390_vm0, %v383_v16, inf }
  0xbb   :  { %v212_v21 = vpop.permute.xlu0 %211  ;;  %451 = vmin.xlane.f32.xlu1 %v988_v20  ;;  %v146_v33 = vmul.f32 %v130_v39, %v130_v39 }
  0xbc   :  { %v992_v29 = vsub.f32 %v212_v21, %v961_v57  ;;  %v225_v21 = vsub.f32 %v956_v54, %v947_v44 }
  0xbd   :  { %v997_v37 = vpop.permute.xlu1 %167 }
  0xbe   :  { %v241_v22 = vmul.f32 %v225_v21, %v225_v21  ;;  %v226_v59 = vsub.f32 %v997_v37, %v947_v44 }
  0xc0   :  { %v276_v41 = vpop.permute.xlu0 %275 }
  0xc1   :  { %v343_v47 = vsub.f32 %v276_v41, %v954_v53  ;;  %v129_v41 = vsub.f32 %v945_v43, %v964_v60 }
  0xc2   :  { %v280_v56 = vpop.permute.xlu1 %279 }
  0xc3   :  { %v359_v55 = vmul.f32 %v343_v47, %v343_v47  ;;  %v344_v58 = vsub.f32 %v280_v56, %v954_v53  ;;  %v257_v47 = vadd.f32 %v241_v22, %v137_v34  ;;  %v145_v26 = vmul.f32 %v129_v41, %v129_v41 }
  0xc5   :  { %v375_v36 = vadd.f32 %v359_v55, %v255_v51  ;;  %v360_v2 = vmul.f32 %v344_v58, %v344_v58  ;;  %v265_v51 = vadd.f32 %v249_v46, %v145_v26  ;;  %v296_v58 = vpop.permute.xlu0 %295 }
  0xc6   :  { %v312_v3 = vpop.permute.xlu1 %311  ;;  %v348_v0 = vsub.f32 %v296_v58, %v954_v53 }
  0xc7   :  { %v1009_v23 = vsel %vm390_vm0, %v375_v36, inf  ;;  %v352_v6 = vsub.f32 %v312_v3, %v970_v4  ;;  %v376_v11 = vadd.f32 %v360_v2, %v256_v32  ;;  %v140_v2 = vmul.f32 %v939_v38, %v939_v38 }
  0xc8   :  { %435 = vmin.xlane.f32.xlu0 %v1009_v23  ;;  %v234_v3 = vsub.f32 %v967_v63, %v961_v57  ;;  %v138_v32 = vmul.f32 %v122_v62, %v122_v62 }
  0xc9   :  { %v368_v9 = vmul.f32 %v352_v6, %v352_v6  ;;  %v393_v17 = vsel %vm390_vm0, %v376_v11, inf  ;;  %v242_v6 = vmul.f32 %v226_v59, %v226_v59  ;;  %v251_v59 = vmul.f32 %v977_v8, %v977_v8 }
  0xca   :  { %v250_v30 = vmul.f32 %v234_v3, %v234_v3  ;;  %v394_v57 = vmin.f32 %v973_v5, %v393_v17 }
  0xcb   :  { %v1016_v12 = vpop.permute.xlu1 %97  ;;  %v384_v13 = vadd.f32 %v368_v9, %v264_v7  ;;  %v364_v9 = vmul.f32 %v348_v0, %v348_v0 }
  0xcc   :  { %449 = vmin.xlane.f32.xlu0 %v1014_v10  ;;  %v266_v63 = vadd.f32 %v250_v30, %v146_v33  ;;  %v131_v26 = vsub.f32 %v1016_v12, %v964_v60 }
  0xcd   :  { %v1020_v16 = vsel %vm390_vm0, %v384_v13, inf  ;;  %v258_v13 = vadd.f32 %v242_v6, %v138_v32 }
  0xce   :  { %453 = vmin.xlane.f32.xlu1 %v1020_v16 }
  0xd0   :  { %437 = vmin.xlane.f32.xlu0 %v393_v17  ;;  %v172_v31 = vpop.permute.xlu1 %171 }
  0xd1   :  { %v227_v5 = vsub.f32 %v172_v31, %v947_v44 }
  0xd5   :  { %v284_v25 = vpop.permute.xlu1 %283 }
  0xd6   :  { %v345_v45 = vsub.f32 %v284_v25, %v954_v53 }
  0xd8   :  { %v361_v48 = vmul.f32 %v345_v45, %v345_v45 }
  0xd9   :  { %v316_v50 = vpop.permute.xlu1 %315 }
  0xda   :  { %v353_v28 = vsub.f32 %v316_v50, %v970_v4  ;;  %v377_v54 = vadd.f32 %v361_v48, %v257_v47 }
  0xdc   :  { %v369_v19 = vmul.f32 %v353_v28, %v353_v28  ;;  %v1035_v52 = vsel %vm390_vm0, %v377_v54, inf  ;;  %v243_v28 = vmul.f32 %v227_v5, %v227_v5  ;;  %v332_v54 = vpop.permute.xlu0 %331 }
  0xdd   :  { %439 = vmin.xlane.f32.xlu0 %v1035_v52  ;;  %v396_v43 = vmin.f32 %v1009_v23, %v1035_v52  ;;  %v357_v31 = vsub.f32 %v332_v54, %v970_v4 }
  0xde   :  { %v103_v49 = vpop.permute.xlu1 %102  ;;  %v385_v55 = vadd.f32 %v369_v19, %v265_v51  ;;  %v139_v19 = vmul.f32 %v936_v35, %v936_v35 }
  0xdf   :  { %v132_v12 = vsub.f32 %v103_v49, %v964_v60  ;;  %v373_v6 = vmul.f32 %v357_v31, %v357_v31 }
  0xe0   :  { %v1041_v56 = vsel %vm390_vm0, %v385_v55, inf  ;;  %v259_v62 = vadd.f32 %v243_v28, %v139_v19 }
  0xe1   :  { %455 = vmin.xlane.f32.xlu1 %v1041_v56  ;;  %v417_v33 = vmin.f32 %v988_v20, %v1041_v56 }
  0xe3   :  { %v176_v61 = vpop.permute.xlu1 %175 }
  0xe4   :  { %v228_v36 = vsub.f32 %v176_v61, %v947_v44  ;;  %v147_v61 = vmul.f32 %v131_v26, %v131_v26 }
  0xe6   :  { %v244_v1 = vmul.f32 %v228_v36, %v228_v36  ;;  %v253_v36 = vmul.f32 %v992_v29, %v992_v29  ;;  %v267_v39 = vadd.f32 %v251_v59, %v147_v61  ;;  %v252_v29 = vmul.f32 %v981_v14, %v981_v14 }
  0xe8   :  { %v288_v37 = vpop.permute.xlu1 %287  ;;  %v260_v7 = vadd.f32 %v244_v1, %v140_v2 }
  0xe9   :  { %v346_v11 = vsub.f32 %v288_v37, %v954_v53  ;;  %v148_v37 = vmul.f32 %v132_v12, %v132_v12 }
  0xea   :  { %v380_v40 = vadd.f32 %v364_v9, %v260_v7 }
  0xeb   :  { %v362_v18 = vmul.f32 %v346_v11, %v346_v11 }
  0xec   :  { %v320_v21 = vpop.permute.xlu1 %319  ;;  %v1063_v46 = vsel %vm390_vm0, %v380_v40, inf }
  0xed   :  { %v354_v38 = vsub.f32 %v320_v21, %v970_v4  ;;  %v378_v34 = vadd.f32 %v362_v18, %v258_v13 }
  0xef   :  { %v370_v15 = vmul.f32 %v354_v38, %v354_v38  ;;  %v397_v22 = vsel %vm390_vm0, %v378_v34, inf  ;;  %v415_v38 = vmin.f32 %v1014_v10, %v1020_v16 }
  0xf0   :  { %v1060_v25 = vmin.f32 %v394_v57, %v397_v22  ;;  %441 = vmin.xlane.f32.xlu0 %v397_v22 }
  0xf1   :  { %v108_v41 = vpop.permute.xlu1 %107  ;;  %v386_v45 = vadd.f32 %v370_v15, %v266_v63 }
  0xf2   :  { %v402_v47 = vmin.f32 %v1060_v25, %v1063_v46  ;;  %v133_v50 = vsub.f32 %v108_v41, %v964_v60 }
  0xf3   :  { %v418_v48 = vsel %vm390_vm0, %v386_v45, inf }
  0xf4   :  { %457 = vmin.xlane.f32.xlu1 %v418_v48  ;;  %v149_v55 = vmul.f32 %v133_v50, %v133_v50  ;;  %v419_v56 = vmin.f32 %v415_v38, %v418_v48 }
  0xf6   :  { %v180_v17 = vpop.permute.xlu1 %179  ;;  %v269_v2 = vadd.f32 %v253_v36, %v149_v55 }
  0xf7   :  { %v229_v8 = vsub.f32 %v180_v17, %v947_v44  ;;  %v268_v44 = vadd.f32 %v252_v29, %v148_v37 }
  0xf8   :  { %v389_v30 = vadd.f32 %v373_v6, %v269_v2 }
  0xf9   :  { %v245_v13 = vmul.f32 %v229_v8, %v229_v8 }
  0xfa   :  { %v424_v20 = vsel %vm390_vm0, %v389_v30, inf }
  0xfb   :  { %v292_v51 = vpop.permute.xlu1 %291 }
  0xfc   :  { %v347_v58 = vsub.f32 %v292_v51, %v954_v53 }
  0xfe   :  { %v363_v0 = vmul.f32 %v347_v58, %v347_v58 }
  0xff   :  { %v324_v1 = vpop.permute.xlu1 %323 }
 0x100   :  { %v355_v35 = vsub.f32 %v324_v1, %v970_v4  ;;  %v379_v3 = vadd.f32 %v363_v0, %v259_v62  ;;  %v520_v1 = vand.u32 127, %v110_v24 }
 0x102   :  { %v371_v32 = vmul.f32 %v355_v35, %v355_v35  ;;  %v399_v7 = vsel %vm390_vm0, %v379_v3, inf  ;;  %v532_v3 = vadd.s32 4294967280, %v520_v1  ;;  %v539_v6 = vadd.s32 4294967272, %v520_v1 }
 0x103   :  { %v328_v9 = vpop.permute.xlu1 %327  ;;  %443 = vmin.xlane.f32.xlu0 %v399_v7  ;;  %v400_v60 = vmin.f32 %v396_v43, %v399_v7  ;;  %v546_v37 = vadd.s32 4294967264, %v520_v1  ;;  %v523_v29 = vsub.s32 %v520_v1, %v923_v27 }
 0x104   :  { %v356_v49 = vsub.f32 %v328_v9, %v970_v4  ;;  %v387_v11 = vadd.f32 %v371_v32, %v267_v39  ;;  %v141_v4 = vmul.f32 %v943_v42, %v943_v42  ;;  %v525_v39 = vadd.s32 4294967288, %v520_v1 }
 0x105   :  { %v553_v32 = vadd.s32 4294967256, %v520_v1  ;;  %v535_v9 = vsub.s32 %v532_v3, %v923_v27  ;;  %v549_v24 = vsub.s32 %v546_v37, %v923_v27 }
 0x106   :  { %v372_v18 = vmul.f32 %v356_v49, %v356_v49  ;;  %v420_v21 = vsel %vm390_vm0, %v387_v11, inf  ;;  %v261_v40 = vadd.f32 %v245_v13, %v141_v4  ;;  %v528_v49 = vsub.s32 %v525_v39, %v923_v27 }
 0x107   :  { %v300_v23 = vpop.permute.xlu1 %299  ;;  %459 = vmin.xlane.f32.xlu1 %v420_v21  ;;  %v421_v52 = vmin.f32 %v417_v33, %v420_v21  ;;  %445 = vmin.xlane.f32.xlu0 %v1063_v46  ;;  %v835_v46 = vmov 0.0   ;;  %v542_v11 = vsub.s32 %v539_v6, %v923_v27  ;;  %v567_v33 = vadd.s32 4294967240, %v520_v1 }
 0x108   :  { %v349_v14 = vsub.f32 %v300_v23, %v954_v53  ;;  %v388_v43 = vadd.f32 %v372_v18, %v268_v44  ;;  %472 = vst.msk [vmem:[#allocation4] sm:$0x3] %vm471_vm3, %v835_v46  ;;  %v556_v18 = vsub.s32 %v553_v32, %v923_v27 }
 0x109   :  { %v425_v34 = vmin.f32 %v421_v52, %v424_v20 }
 0x10a   :  { %v365_v57 = vmul.f32 %v349_v14, %v349_v14  ;;  %v422_v63 = vsel %vm390_vm0, %v388_v43, inf }
 0x10b   :  { %461 = vmin.xlane.f32.xlu1 %v422_v63  ;;  %v423_v10 = vmin.f32 %v419_v56, %v422_v63 }
 0x10c   :  { %v381_v16 = vadd.f32 %v365_v57, %v261_v40  ;;  %v570_v57 = vsub.s32 %v567_v33, %v923_v27 }
 0x10d   :  { %v426_v15 = vmin.f32 %v423_v10, %v425_v34 }
 0x10e   :  { %v403_v22 = vsel %vm390_vm0, %v381_v16, inf }
 0x10f   :  { %v404_v41 = vmin.f32 %v400_v60, %v403_v22  ;;  %447 = vmin.xlane.f32.xlu0 %v403_v22  ;;  %463 = vmin.xlane.f32.xlu1 %v424_v20  ;;  %v427_v42 = vrot.slane %v426_v15, 4  ;;  %v560_v60 = vadd.s32 4294967248, %v520_v1 }
 0x111   :  { %v405_v53 = vmin.f32 %v402_v47, %v404_v41  ;;  %v428_v45 = vmin.f32 %v426_v15, %v427_v42  ;;  %v563_v23 = vsub.s32 %v560_v60, %v923_v27 }
 0x113   :  { %v406_v48 = vrot.slane %v405_v53, 4  ;;  %v429_v5 = vrot.slane %v428_v45, 2 }
 0x115   :  { %v407_v17 = vmin.f32 %v405_v53, %v406_v48  ;;  %v430_v50 = vmin.f32 %v428_v45, %v429_v5 }
 0x117   :  { %v408_v26 = vrot.slane %v407_v17, 2  ;;  %v431_v54 = vrot.slane %v430_v50, 1 }
 0x119   :  { %v409_v28 = vmin.f32 %v407_v17, %v408_v26  ;;  %v432_v55 = vmin.f32 %v430_v50, %v431_v54 }
 0x11b   :  { %v410_v51 = vrot.slane %v409_v28, 1 }
 0x11d   :  { %v411_v19 = vmin.f32 %v409_v28, %v410_v51 }
 0x11f   :  { %v479_v58 = vsel %vm478_vm1, %v432_v55, %v411_v19 }
 0x120   :  { %484 = vst.msk [vmem:[#allocation2] sm:$0x3] %vm483_vm2, %v479_v58 }
 0x127   :  { %v744_v59 = vld [vmem:[#allocation2] sm:$0x3] }
 0x128   :  { %v746_v25 = vsel %vm483_vm2, %v744_v59, 0.0 }
 0x129   :  { %747 = vadd.xlane.f32.xlu0 %v746_v25 }
 0x140   :  { %v434_v31 = vpop.xlane.xlu1 %433 }
 0x141   :  { %v524_v52 = vrot.slane %v434_v31, %v523_v29 }
 0x148   :  { %v452_v36 = vpop.xlane.xlu1 %451 }
 0x149   :  { %v581_v4 = vrot.slane %v452_v36, %v528_v49 }
 0x155   :  { %v436_v47 = vpop.xlane.xlu0 %435 }
 0x156   :  { %v529_v44 = vrot.slane %v436_v47, %v528_v49 }
 0x158   :  { %v531_v63 = vsel %vm530_vm4, %v529_v44, %v524_v52 }
 0x159   :  { %v450_v61 = vpop.xlane.xlu0 %449 }
 0x15a   :  { %v577_v13 = vrot.slane %v450_v61, %v523_v29  ;;  %v749_v61 = vld [vmem:[#allocation4] sm:$0x3] }
 0x15b   :  { %v454_v12 = vpop.xlane.xlu1 %453 }
 0x15c   :  { %v586_v21 = vrot.slane %v454_v12, %v535_v9  ;;  %v582_v10 = vsel %vm530_vm4, %v581_v4, %v577_v13 }
 0x15d   :  { %v438_v62 = vpop.xlane.xlu0 %437 }
 0x15e   :  { %v536_v38 = vrot.slane %v438_v62, %v535_v9  ;;  %v587_v22 = vsel %vm537_vm5, %v586_v21, %v582_v10 }
 0x160   :  { %v538_v41 = vsel %vm537_vm5, %v536_v38, %v531_v63 }
 0x16a   :  { %v440_v0 = vpop.xlane.xlu0 %439 }
 0x16b   :  { %v543_v14 = vrot.slane %v440_v0, %v542_v11 }
 0x16d   :  { %v545_v45 = vsel %vm544_vm6, %v543_v14, %v538_v41 }
 0x16e   :  { %v456_v2 = vpop.xlane.xlu1 %455 }
 0x16f   :  { %v591_v43 = vrot.slane %v456_v2, %v542_v11 }
 0x171   :  { %v592_v48 = vsel %vm544_vm6, %v591_v43, %v587_v22 }
 0x17d   :  { %v442_v35 = vpop.xlane.xlu0 %441 }
 0x17e   :  { %v550_v56 = vrot.slane %v442_v35, %v549_v24 }
 0x180   :  { %v552_v5 = vsel %vm551_vm7, %v550_v56, %v545_v45 }
 0x181   :  { %v458_v8 = vpop.xlane.xlu1 %457 }
 0x182   :  { %v596_v34 = vrot.slane %v458_v8, %v549_v24 }
 0x184   :  { %v597_v27 = vsel %vm551_vm7, %v596_v34, %v592_v48 }
 0x190   :  { %v444_v7 = vpop.xlane.xlu0 %443 }
 0x191   :  { %v557_v16 = vrot.slane %v444_v7, %v556_v18 }
 0x193   :  { %v559_v26 = vsel %vm558_vm8, %v557_v16, %v552_v5 }
 0x194   :  { %v460_v30 = vpop.xlane.xlu1 %459  ;;  %v446_v20 = vpop.xlane.xlu0 %445 }
 0x195   :  { %v601_v15 = vrot.slane %v460_v30, %v556_v18  ;;  %v564_v42 = vrot.slane %v446_v20, %v563_v23 }
 0x197   :  { %v602_v28 = vsel %vm558_vm8, %v601_v15, %v597_v27  ;;  %v566_v19 = vsel %vm565_vm9, %v564_v42, %v559_v26 }
 0x198   :  { %v462_v40 = vpop.xlane.xlu1 %461 }
 0x199   :  { %v606_v53 = vrot.slane %v462_v40, %v563_v23 }
 0x19b   :  { %v607_v55 = vsel %vm565_vm9, %v606_v53, %v602_v28 }
 0x19c   :  { %v464_v17 = vpop.xlane.xlu1 %463  ;;  %v448_v50 = vpop.xlane.xlu0 %447 }
 0x19d   :  { %v611_v54 = vrot.slane %v464_v17, %v570_v57  ;;  %v571_v51 = vrot.slane %v448_v50, %v570_v57 }
 0x19f   :  { %v612_v58 = vsel %vm572_vm10, %v611_v54, %v607_v55  ;;  %v573_v59 = vsel %vm572_vm10, %v571_v51, %v566_v19 }
 0x1a0   :  { %v614_v25 = vsel %vm478_vm1, %v612_v58, %v573_v59 }
 0x1a1   :  { %617 = vst.msk [vmem:[#allocation3] sm:$0x3] %vm483_vm2, %v614_v25 }
 0x1a8   :  { %v757_v46 = vld [vmem:[#allocation3] sm:$0x3] }
 0x1a9   :  { %v759_v47 = vsel %vm483_vm2, %v757_v46, 0.0 }
 0x1aa   :  { %760 = vadd.xlane.f32.xlu1 %v759_v47 }
 0x1b6   :  { %v748_v31 = vpop.xlane.xlu0 %747 }
 0x1b7   :  { %v750_v36 = vmul.f32 0.015625, %v748_v31 }
 0x1b9   :  { %v751_v62 = vadd.f32 %v750_v36, %v749_v61 }
 0x1bb   :  { %753 = vst.msk [vmem:[#allocation4] sm:$0x3] %vm752_vm11, %v751_v62 }
 0x1c2   :  { %v762_v1 = vld [vmem:[#allocation4] sm:$0x3] }
 0x237   :  { %v761_v12 = vpop.xlane.xlu1 %760 }
 0x238   :  { %v763_v0 = vmul.f32 0.015625, %v761_v12 }
 0x23a   :  { %v764_v2 = vadd.f32 %v763_v0, %v762_v1 }
 0x23c   :  { %766 = vst.msk [vmem:[#allocation4] sm:$0x3] %vm765_vm12, %v764_v2 }
 0x23d   :  { %819 = shalt.err (!%p816_p4)
}
 0x23e   :  { %s820_s20 = scalar_lea.hbm %s1144_s2, 32 }
 0x23f   :  { %p821_p5 = scmp.ne.s32.totalorder %s1144_s2, %s820_s20  ;;  %p824_p6 = scmp.lt.u32.totalorder %s820_s20, %s1144_s2 }
 0x241   :  { %p826_p7 = pnand %p824_p6, %p821_p5 }
 0x243   :  { %829 = shalt.err (!%p826_p7)
}
 0x244   :  { %776 = dma.vmem_to_hbm [thread:$0]  %s774_s16, 32, %s1144_s2, [#allocation5]  }
 0x245   :  { %830 = dma.done.wait [#allocation5], 32  }
 0x246   :  { %831 = vsyncadd [#allocation5], 4294967264 }
 0x247   :  { %780 = vsyncpa [#allocation5], 1 }

</bundles_post_ra>
